<compile_context>
chip_gen: v7x
topology: tpu7x:2x2x1
jax: 0.10.0
libtpu: 0.0.40
codegen_flags: <defaults>
</compile_context>

<pallas_src>
import jax
import jax.numpy as jnp
from jax import lax
from jax.experimental import pallas as pl
from jax.experimental.pallas import tpu as pltpu


def _graph_learner_kernel(ctx_ref, w_ref, out_ref):
    """Grid = (batch,).

    ctx_ref: (ctx, dim)        -- batch dim squeezed out by BlockSpec
    w_ref:   (dim, P*hidden)   -- all perspectives fused, pre-scaled by 1/sqrt(P)
    out_ref: (ctx, ctx) f32
    """
    x = ctx_ref[...]                       # (C, D)
    w = w_ref[...]                         # (D, P*H)

    # relu(context @ W_all): one MXU pass with K = D, N = P*H; f32 accumulate.
    xf = jnp.maximum(
        jnp.dot(x, w, preferred_element_type=jnp.float32), 0.0
    )                                      # (C, P*H) f32

    # Gram matrix xf @ xf^T without materializing a transpose: contract axis 1
    # of both operands. Feed the MXU in the compute dtype, accumulate in f32.
    xf_c = xf.astype(w.dtype)
    gram = lax.dot_general(
        xf_c, xf_c,
        dimension_numbers=(((1,), (1,)), ((), ())),
        preferred_element_type=jnp.float32,
    )                                      # (C, C) f32

    out_ref[...] = gram.astype(out_ref.dtype)


def graph_learner_attention(context, weights, *, compute_dtype=jnp.float32):
    """context: (B, C, D); weights: (P, D, H) (= torch W_p^T stacked).

    Returns similarity: (B, C, C) float32.
    """
    B, C, D = context.shape
    P, Dw, H = weights.shape
    assert D == Dw

    # Fuse perspectives: (P, D, H) -> (D, P*H), and fold the mean over
    # perspectives into the weights (scale by 1/sqrt(P); Gram scales by 1/P).
    w_all = jnp.transpose(weights, (1, 0, 2)).reshape(D, P * H)
    w_all = (w_all * (1.0 / jnp.sqrt(jnp.float32(P)))).astype(compute_dtype)
    ctx = context.astype(compute_dtype)

    return pl.pallas_call(
        _graph_learner_kernel,
        out_shape=jax.ShapeDtypeStruct((B, C, C), jnp.float32),
        grid_spec=pltpu.PrefetchScalarGridSpec(
            num_scalar_prefetch=0,
            grid=(B,),
            in_specs=[
                pl.BlockSpec((pl.Squeezed(), C, D), lambda b: (b, 0, 0)),
                pl.BlockSpec((D, P * H), lambda b: (0, 0)),
            ],
            out_specs=pl.BlockSpec((pl.Squeezed(), C, C), lambda b: (b, 0, 0)),
        ),
        compiler_params=pltpu.CompilerParams(
            dimension_semantics=("parallel",)
        ),
    )(ctx, w_all)


def _reference(context, weights):
    # Plain-JAX reference matching the PyTorch per-perspective loop (f32).
    P = weights.shape[0]
    sim = 0.0
    for p in range(P):
        xf = jax.nn.relu(context @ weights[p])           # (B, C, H)
        sim = sim + jnp.einsum("bch,bkh->bck", xf, xf)   # (B, C, C)
    return sim / P


if __name__ == "__main__":
    # Small shapes consistent with the module's forward.
    batch, ctx_size, input_size, hidden_size, num_pers = 2, 8, 16, 32, 16

    key = jax.random.PRNGKey(0)
    k_ctx, k_w = jax.random.split(key)

    context = jax.random.normal(k_ctx, (batch, ctx_size, input_size), jnp.float32)
    # nn.Linear(input_size, hidden_size, bias=False) weights: (hidden, input).
    # Deterministic synthetic init (kaiming-uniform-ish scale), then transpose
    # to (num_pers, input, hidden) for right-multiply in the kernel.
    bound = 1.0 / (input_size ** 0.5)
    w_torch_layout = jax.random.uniform(
        k_w, (num_pers, hidden_size, input_size), jnp.float32, -bound, bound
    )
    weights = jnp.transpose(w_torch_layout, (0, 2, 1))   # (P, D, H)

    ref = _reference(context, weights)

    # f32 path: tight tolerance.
    out_f32 = graph_learner_attention(context, weights, compute_dtype=jnp.float32)
    out_f32 = jax.block_until_ready(out_f32)
    assert out_f32.shape == (batch, ctx_size, ctx_size)
    assert jnp.allclose(out_f32, ref, atol=1e-4, rtol=1e-4), "f32 mismatch vs reference"

    # bf16 operands (MXU-native), f32 accumulation: relaxed tolerance.
    out_bf16 = graph_learner_attention(context, weights, compute_dtype=jnp.bfloat16)
    out_bf16 = jax.block_until_ready(out_bf16)
    assert jnp.allclose(out_bf16, ref, atol=5e-2, rtol=5e-2), "bf16 mismatch vs reference"

    print("KERNEL_OK")
</pallas_src>

<mosaic_0001>
module attributes {stable_mosaic.version = 11 : i64} {
  func.func @_graph_learner_kernel(%arg0: i32, %arg1: memref<1x8x16xf32, #tpu.memory_space<vmem>>, %arg2: memref<16x512xf32, #tpu.memory_space<vmem>>, %arg3: memref<1x8x8xf32, #tpu.memory_space<vmem>>) attributes {dimension_semantics = [#tpu.dimension_semantics<parallel>], iteration_bounds = array<i64: 2>, scalar_prefetch = 0 : i64, scratch_operands = 0 : i64, tpu.core_type = #tpu.core_type<tc>, window_params = [{transform_indices = @transform_0, window_bounds = array<i64: 1, 8, 16>}, {pipeline_mode = #tpu.pipeline_mode<synchronous>, transform_indices = @transform_1, window_bounds = array<i64: 16, 512>}, {transform_indices = @transform_2, window_bounds = array<i64: 1, 8, 8>}]} {
    %c0 = arith.constant 0 : index
    %c0_0 = arith.constant 0 : index
    %c0_1 = arith.constant 0 : index
    %0 = vector.load %arg1[%c0, %c0_0, %c0_1] : memref<1x8x16xf32, #tpu.memory_space<vmem>>, vector<1x8x16xf32>
    %1 = vector.shape_cast %0 : vector<1x8x16xf32> to vector<8x16xf32>
    %c0_2 = arith.constant 0 : index
    %c0_3 = arith.constant 0 : index
    %2 = vector.load %arg2[%c0_2, %c0_3] : memref<16x512xf32, #tpu.memory_space<vmem>>, vector<16x512xf32>
    %cst = arith.constant dense<0.000000e+00> : vector<8x512xf32>
    %3 = tpu.matmul %1, %2, %cst {dimension_numbers = #tpu.dot_dimension_numbers<[1], [0], [0], [1], [0, 0, 1, 1], [], []>} : vector<8x16xf32>, vector<16x512xf32>, vector<8x512xf32> -> vector<8x512xf32>
    %cst_4 = arith.constant 0.000000e+00 : f32
    %4 = vector.broadcast %cst_4 : f32 to vector<8x512xf32>
    %5 = arith.maximumf %3, %4 : vector<8x512xf32>
    %cst_5 = arith.constant dense<0.000000e+00> : vector<8x8xf32>
    %6 = tpu.matmul %5, %5, %cst_5 {dimension_numbers = #tpu.dot_dimension_numbers<[1], [1], [0], [0], [0, 0, 1, 0], [], []>} : vector<8x512xf32>, vector<8x512xf32>, vector<8x8xf32> -> vector<8x8xf32>
    %c0_6 = arith.constant 0 : index
    %c0_7 = arith.constant 0 : index
    %c0_8 = arith.constant 0 : index
    %7 = vector.load %arg3[%c0_6, %c0_7, %c0_8] : memref<1x8x8xf32, #tpu.memory_space<vmem>>, vector<1x8x8xf32>
    %8 = vector.shape_cast %7 : vector<1x8x8xf32> to vector<8x8xf32>
    %9 = vector.shape_cast %6 : vector<8x8xf32> to vector<1x8x8xf32>
    tpu.vector_store %arg3[%c0_6, %c0_7, %c0_8], %9 {strides = array<i32>} : memref<1x8x8xf32, #tpu.memory_space<vmem>>, vector<1x8x8xf32>,
    return
  }
  func.func @transform_0(%arg0: i32) -> (i32, i32, i32) {
    %c0_i32 = arith.constant 0 : i32
    %c0_i32_0 = arith.constant 0 : i32
    %c0_i32_1 = arith.constant 0 : i32
    return %arg0, %c0_i32, %c0_i32_0 : i32, i32, i32
  }
  func.func @transform_1(%arg0: i32) -> (i32, i32) {
    %c0_i32 = arith.constant 0 : i32
    %c0_i32_0 = arith.constant 0 : i32
    %c0_i32_1 = arith.constant 0 : i32
    return %c0_i32, %c0_i32_0 : i32, i32
  }
  func.func @transform_2(%arg0: i32) -> (i32, i32, i32) {
    %c0_i32 = arith.constant 0 : i32
    %c0_i32_0 = arith.constant 0 : i32
    %c0_i32_1 = arith.constant 0 : i32
    return %arg0, %c0_i32, %c0_i32_0 : i32, i32, i32
  }
}

</mosaic_0001>

<bundles_post_ra>
// kernel: tpu_custom_call.1
= control target key start
LH: loop header
LB: loop body
LE: loop exit
PB: predicated region body
PF: predicated region fallthrough
CT: control target
= control target key end

     0   :  { %7 = vsyncpa [#allocation3], 0  ;;  %s1006_s0 = inlined_call_operand.hbm [shape: f32[2,8,16], index: 0, kind: input, shape index: {}]   ;;  %s1007_s1 = inlined_call_operand.hbm [shape: f32[16,512], index: 1, kind: input, shape index: {}]   ;;  %s1008_s2 = inlined_call_operand.hbm [shape: f32[2,8,8], index: 2, kind: output, shape index: {}]  }
   0x1   :  { %9 = vsyncpa [#allocation3 + $0x1], 0 }
   0x2   :  { %10 = vsyncpa [#allocation6], 0 }
   0x3   :  { %11 = vsyncpa [#allocation4], 0 }
   0x4   :  { %13 = vsyncpa [#allocation4 + $0x1], 0  ;;  %s806_s9 = smov 0   ;;  %s808_s10 = smov 0  }
   0x5   :  { %s810_s11 = smov 0   ;;  %s812_s12 = smov 0  }
   0x6 LB: > { %s827_s13 = sadd.s32 4294967295, %s783_s12   ;;  %s569_s14 = sadd.s32 4294967294, %s783_s12   ;;  %s783_s12 = sphi %s812_s12, %s1028_s12   ;;  %s779_s11 = sphi %s810_s11, %s1027_s11   ;;  %s775_s10 = sphi %s808_s10, %s1026_s10   ;;  %s771_s9 = sphi %s806_s9, %s1025_s9  }
   0x7   : > { %p39_p0 = scmp.ne.s32.totalorder %s775_s10, %s771_s9  ;;  %p1009_p1 = scmp.eq.s32.totalorder %s827_s13, 0 }
   0x8   : > { %p90_p3 = scmp.eq.s32.totalorder %s569_s14, 1  ;;  %p570_p5 = scmp.ge.s32.totalorder %s783_s12, 1 }
   0x9   : > { %p836_p4 = por %p1009_p1, %p39_p0  ;;  %p97_p7 = scmp.lt.s32.totalorder %s783_s12, 3 }
   0xa   : > { %p841_p6 = por %p90_p3, %p39_p0  ;;  %s785_s18 = smov [#allocation5]  }
   0xb   : > { %s1012_s15 = scalar_select %p836_p4, 1, 0 }
   0xc   : > { %s1013_s16 = scalar_select %p841_p6, 1, 0 }
   0xd   : > { %p846_p8 = pnand %p570_p5, %p97_p7  ;;  %s109_s19 = sshll.u32 %s785_s18, 4  ;;  %s850_s19 = int_to_ptr.vmem [resolvable:$true] %s109_s19 }
   0xe   : > { %s862_s21 = sadd.s32 1, %s783_s12   ;;  %s26_s22 = sadd.s32 1, %s779_s11 }
   0xf   : > { %s1014_s17 = scalar_select %p846_p8, 1, 0 }
  0x10   : > { %p603_p9 = pneg %p846_p8  ;;  %s23_s23 = ssub.s32 %s783_s12, %s862_s21 }
  0x11   : > { %s655_s26 = scalar_lea.hbm %s1007_s1, 1024 }
  0x12   : > { %p857_p11 = pnand %p603_p9, %p1009_p1  ;;  %p656_p12 = scmp.ne.s32.totalorder %s1007_s1, %s655_s26 }
  0x13   : > { %p662_p5 = scmp.lt.u32.totalorder %s655_s26, %s1007_s1 }
  0x14   : > { %p657_p13 = pneg %p857_p11 }
  0x16   : > { %p658_p0 = pnand %p657_p13, %p656_p12 }
  0x18   : > { %p659_p3 = pneg %p658_p0 }
  0x1a   : > { %p664_p7 = pnand %p662_p5, %p659_p3 }
  0x1c   : > { %667 = shalt.err (!%p664_p7)
}
  0x1d   : > { %s668_s3 = scalar_lea.vmem %s850_s19, 1024  ;;  %p676_p2 = scmp.lt.s32.totalorder %s850_s19, %s850_s19 }
  0x1e   : > { %p669_p9 = scmp.ne.s32.totalorder %s850_s19, %s668_s3  ;;  %p677_p6 = scmp.lt.s32.totalorder %s668_s3, %s668_s3 }
  0x20   : > { %p671_p10 = pnand %p669_p9, %p657_p13  ;;  %p678_p4 = por %p677_p6, %p676_p2 }
  0x22   : > { %p672_p1 = pneg %p671_p10 }
  0x24   : > { %p679_p8 = pnand %p678_p4, %p672_p1 }
  0x26   : > { %682 = shalt.err (!%p679_p8)
}
  0x27   : > { %s786_s4 = smov 512   ;;  %s787_s5 = smov 32  }
  0x28   : > { %606 = dma.hbm_to_vmem [thread:$0]  (!%p857_p11), %s1007_s1, 1024, %s850_s19, [#allocation6], %s786_s4, %s786_s4, %s787_s5  }
  0x29   : > { %p24_p2 = scmp.eq.s32.totalorder %s23_s23, 0  ;;  %p33_p1 = scmp.ne.s32.totalorder %s779_s11, %s775_s10 }
  0x2a   : > { %p34_p4 = scmp.eq.s32.totalorder %s783_s12, 0  ;;  %p616_p6 = scmp.lt.s32.totalorder %s783_s12, 2 }
  0x2b   : > { %s893_s8 = scalar_select %p24_p2, %s779_s11, %s26_s22  }
  0x2c   : > { %p35_p8 = por %p34_p4, %p33_p1  ;;  %p1016_p10 = scmp.eq.s32.totalorder %s827_s13, 1 }
  0x2d   : > { %s123_s18 = sand.u32 1, %s779_s11   ;;  %s574_s24 = sshll.u32 %s783_s12, 7 }
  0x2e   : > { %p897_p12 = por %p1016_p10, %p33_p1  ;;  %s573_s25 = sshll.u32 %s123_s18, 3 }
  0x2f   : > { %s906_s27 = scalar_lea.hbm %s1006_s0, %s574_s24  ;;  %s127_s19 = scalar_lea.vmem [#allocation2], %s573_s25 }
  0x30   : > { %s134_s22 = sshll.u32 %s127_s19, 4  ;;  %p908_p11 = pnand %p616_p6, %p35_p8  ;;  %s912_s22 = int_to_ptr.vmem [resolvable:$true] %s134_s22 }
  0x31   : > { %s124_s28 = scalar_lea.sflag [#allocation3], %s123_s18  ;;  %s683_s29 = scalar_lea.hbm %s906_s27, 128 }
  0x32   : > { %p684_p13 = scmp.ne.s32.totalorder %s906_s27, %s683_s29  ;;  %p685_p0 = pneg %p908_p11 }
  0x33   : > { %s688_s4 = scalar_lea.hbm %s1006_s0, 256  ;;  %p689_p7 = scmp.lt.u32.totalorder %s906_s27, %s1006_s0 }
  0x34   : > { %p686_p3 = pnand %p685_p0, %p684_p13  ;;  %p690_p9 = scmp.lt.u32.totalorder %s688_s4, %s683_s29 }
  0x35   : > { %p692_p1 = scmp.lt.u32.totalorder %s683_s29, %s906_s27 }
  0x36   : > { %p687_p5 = pneg %p686_p3  ;;  %p691_p2 = por %p690_p9, %p689_p7 }
  0x38   : > { %p693_p4 = por %p692_p1, %p691_p2 }
  0x3a   : > { %p694_p6 = pnand %p693_p4, %p687_p5 }
  0x3c   : > { %697 = shalt.err (!%p694_p6)
}
  0x3d   : > { %s698_s7 = scalar_lea.vmem %s912_s22, 128  ;;  %s788_s18 = smov [#allocation2]  }
  0x3e   : > { %p699_p8 = scmp.ne.s32.totalorder %s912_s22, %s698_s7  ;;  %s703_s24 = sshll.u32 %s788_s18, 4  ;;  %s704_s24 = int_to_ptr.vmem [resolvable:$false] %s703_s24 }
  0x3f   : > { %s705_s25 = scalar_lea.vmem %s704_s24, 256  ;;  %p706_p3 = scmp.lt.s32.totalorder %s912_s22, %s704_s24 }
  0x40   : > { %p701_p10 = pnand %p699_p8, %p685_p0  ;;  %p707_p7 = scmp.lt.s32.totalorder %s705_s25, %s698_s7 }
  0x42   : > { %p702_p13 = pneg %p701_p10  ;;  %p708_p9 = por %p707_p7, %p706_p3 }
  0x44   : > { %p709_p2 = pnand %p708_p9, %p702_p13 }
  0x46   : > { %712 = shalt.err (!%p709_p2)
}
  0x47   : > { %610 = dma.hbm_to_vmem [thread:$0]  (!%p908_p11), %s906_s27, 128, %s912_s22, %s124_s28  }
  0x48   : > { %p1019_p5 = scmp.ne.s32.totalorder %s1014_s17, 0 }
  0x49   : > { %s942_s20 = sand.u32 (!%p1019_p5), 1, %s775_s10   ;;  %p1020_p0 = scmp.ne.s32.totalorder (!%p1019_p5), %s1012_s15, 0 }
  0x4a   : > { %143 = sbr.rel (%p1019_p5) target bundleno = 546 (0x222), region = 28  ;;  %s576_s26 = sshll.u32 (!%p1019_p5), %s942_s20, 3 }
  0x4b   : > { %s146_s19 = scalar_lea.sflag (!%p1019_p5), [#allocation3], %s942_s20  ;;  %s149_s29 = scalar_lea.vmem (!%p1019_p5), [#allocation2], %s576_s26 }
  0x51   : > { %758 = dma.done.wait (%p1020_p0), %s146_s19, 128  }
  0x52   : > { %760 = vsyncadd (%p1020_p0), %s146_s19, 4294967168  ;;  %p1021_p11 = scmp.eq.s32.totalorder %s827_s13, 0 }
  0x54   : > { %762 = dma.done.wait (%p1021_p11), [#allocation6], 1024   ;;  %p1022_p1 = pmov %p1021_p11 }
  0x55   : > { %v789_v0 = vmov 0.0   ;;  %v176_v1 = vld [vmem:[#allocation5 + $0x8] sm:$0xff]  ;;  %v175_v3 = vld [vmem:[#allocation5] sm:$0xff]  ;;  %v178_v6 = vld [vmem:[#allocation5 + $0x18] sm:$0xff]  ;;  %vm183_vm0 = vcmask 130048   ;;  %s582_s15 = sshll.u32 %s827_s13, 7 }
  0x56   : > { %764 = vsyncadd (%p1022_p1), [#allocation6], 4294966272  ;;  %251 = vmatprep.mubr.f32.mxu1 %v789_v0  ;;  %v180_v2 = vld [vmem:[#allocation5 + $0x28] sm:$0xff]  ;;  %v179_v5 = vld [vmem:[#allocation5 + $0x20] sm:$0xff]  ;;  %s173_s17 = scalar_lea.vmem [#allocation7], %s576_s26  ;;  %vm473_vm1 = vcmask 64512   ;;  %s962_s28 = scalar_lea.hbm %s1008_s2, %s582_s15 }
  0x57   : > { %v585_v4 = vpack.c.bf16 %v180_v2, %v176_v1  ;;  %v587_v7 = vpack.c.bf16 %v179_v5, %v175_v3  ;;  %v182_v8 = vld [vmem:[#allocation5 + $0x38] sm:$0xff]  ;;  %v177_v9 = vld [vmem:[#allocation5 + $0x10] sm:$0xff]  ;;  %s489_s27 = sshll.u32 %s173_s17, 4  ;;  %s476_s30 = scalar_lea.sflag [#allocation4], %s942_s20  ;;  %s964_s27 = int_to_ptr.vmem [resolvable:$true] %s489_s27 }
  0x58   : > { %v181_v10 = vld [vmem:[#allocation5 + $0x30] sm:$0xff]  ;;  %v589_v11 = vpack.c.bf16 %v182_v8, %v178_v6  ;;  %s713_s3 = scalar_lea.vmem %s964_s27, 128  ;;  %s790_s13 = smov [#allocation7]  }
  0x59   : > { %586 = vmatprep.subr.bf16.mxu1 %v585_v4  ;;  %v174_v12 = vld [vmem:[%s149_s29] sm:$0xff]  ;;  %v591_v13 = vpack.c.bf16 %v181_v10, %v177_v9  ;;  %p714_p4 = scmp.ne.s32.totalorder %s964_s27, %s713_s3  ;;  %s717_s4 = sshll.u32 %s790_s13, 4  ;;  %s718_s4 = int_to_ptr.vmem [resolvable:$false] %s717_s4 }
  0x5a   : > { %588 = vmatpush1.bf16.msra.mxu1 %v587_v7  ;;  %s719_s5 = scalar_lea.vmem %s718_s4, 256  ;;  %p720_p10 = scmp.lt.s32.totalorder %s964_s27, %s718_s4 }
  0x5b   : > { %590 = vmatprep.subr.bf16.mxu1 %v589_v11  ;;  %p715_p6 = pnand %p714_p4, %p897_p12  ;;  %p721_p13 = scmp.lt.s32.totalorder %s719_s5, %s713_s3 }
  0x5d   : > { %579 = vmatmul.mubr.msk.f32.vlgmr.msra.gmra.mrb[0].mxu1 %vm183_vm0, %v174_v12  ;;  %p716_p8 = pneg %p715_p6  ;;  %p722_p3 = por %p721_p13, %p720_p10 }
  0x5e   : > { %592 = vmatpush1.bf16.msra.mxu1 %v591_v13  ;;  %322 = vmatprep.mubr.f32.mxu1 %v789_v0 }
  0x5f   : > { %p723_p7 = pnand %p722_p3, %p716_p8 }
  0x61   : > { %580 = vmatmul.mubr.msk.f32.vlgmr.msra.gmra.mrb[2].mxu1 %vm183_vm0, %v174_v12 }
 0x130   : > { %v253_v14 = vpop.f32.mrb[0].mxu1 }
 0x131   : > { %v255_v15 = vpop.f32.mrb[1].mxu1  ;;  %v329_v17 = vmax.f32 %v253_v14, 0.0 }
 0x132   : > { %v330_v16 = vmax.f32 %v255_v15, 0.0 }
 0x134   : > { %v324_v18 = vpop.f32.mrb[2].mxu1  ;;  %333 = vmatprep.subr.mxu0 %v330_v16  ;;  %397 = vmatprep.mubr.f32.mxu0 %v330_v16 }
 0x135   : > { %v331_v19 = vmax.f32 %v324_v18, 0.0  ;;  %v326_v20 = vpop.f32.mrb[3].mxu1  ;;  %334 = vmatpush1.xpose.msra.mxu0 %v329_v17 }
 0x136   : > { %v332_v21 = vmax.f32 %v326_v20, 0.0 }
 0x138   : > { %398 = vmatmul.mubr.f32.vlgmr.msra.gmra.mrb[0].mxu0 %v329_v17  ;;  %403 = vmatprep.subr.mxu0 %v332_v21 }
 0x139   : > { %404 = vmatpush1.xpose.msra.mxu0 %v331_v19  ;;  %467 = vmatprep.mubr.f32.mxu0 %v332_v21 }
 0x140   : > { %468 = vmatmul.mubr.f32.vlgmr.msra.gmra.mrb[0].mxu0 %v331_v19 }
 0x213   : > { %v469_v22 = vpop.f32.mrb[0].mxu0 }
 0x214   : > { %474 = vst.msk [vmem:[%s173_s17] sm:$0xff] %vm473_vm1, %v469_v22  ;;  %v471_v23 = vpop.f32.mrb[1].mxu0 }
 0x215   : > { %726 = shalt.err (!%p723_p7)
}
 0x216   : > { %s727_s6 = scalar_lea.hbm %s962_s28, 128  ;;  %s731_s24 = scalar_lea.hbm %s1008_s2, 256 }
 0x217   : > { %p728_p9 = scmp.ne.s32.totalorder %s962_s28, %s727_s6  ;;  %p732_p0 = scmp.lt.u32.totalorder %s962_s28, %s1008_s2 }
 0x218   : > { %p733_p11 = scmp.lt.u32.totalorder %s731_s24, %s727_s6  ;;  %p735_p4 = scmp.lt.u32.totalorder %s727_s6, %s962_s28 }
 0x219   : > { %p729_p2 = pnand %p728_p9, %p897_p12 }
 0x21a   : > { %p734_p1 = por %p733_p11, %p732_p0 }
 0x21b   : > { %p730_p5 = pneg %p729_p2 }
 0x21c   : > { %p736_p6 = por %p735_p4, %p734_p1 }
 0x21e   : > { %p737_p8 = pnand %p736_p6, %p730_p5 }
 0x220   : > { %740 = shalt.err (!%p737_p8)
}
 0x221   : > { %601 = dma.vmem_to_hbm [thread:$0]  (%p897_p12), %s964_s27, 128, %s962_s28, %s476_s30  }
 0x222 PF: > { %s501_s26 = sand.u32 1, %s771_s9   ;;  %p1023_p10 = scmp.ne.s32.totalorder %s1013_s16, 0 }
 0x223   : > { %p1024_p13 = scmp.ge.s32.totalorder %s783_s12, 2  ;;  %s502_s19 = scalar_lea.sflag [#allocation4], %s501_s26 }
 0x225   : > { %p612_p3 = pnand %p1024_p13, %p1023_p10 }
 0x227   : > { %766 = dma.done.wait (!%p612_p3), %s502_s19, 128  }
 0x228   : > { %768 = vsyncadd (!%p612_p3), %s502_s19, 4294967168  ;;  %p16_p7 = scmp.ge.s32.totalorder %s862_s21, 4   ;;  %s1025_s9 = smov %s775_s10 }
 0x229   : > { %s1026_s10 = smov %s779_s11  ;;  %s1027_s11 = smov %s893_s8 }
 0x22a   : > { %s1028_s12 = smov %s862_s21  ;;  %18 = sbr.rel (!%p16_p7) target bundleno = 6 (0x6), region = 77 }
 0x231   :  { %507 = vsyncpa [#allocation3], 1 }
 0x232   :  { %509 = vsyncpa [#allocation3 + $0x1], 1 }
 0x233   :  { %510 = vsyncpa [#allocation6], 1 }
 0x234   :  { %511 = vsyncpa [#allocation4], 1 }
 0x235   :  { %513 = vsyncpa [#allocation4 + $0x1], 1 }

</bundles_post_ra>
